<compile_context>
chip_gen: v7x
topology: tpu7x:2x2x1
jax: 0.10.0
libtpu: 0.0.40
codegen_flags: <defaults>
</compile_context>

<pallas_src>
import functools

import jax
import jax.numpy as jnp
from jax.experimental import pallas as pl
from jax.experimental.pallas import tpu as pltpu


def _round_up(n: int, m: int) -> int:
    return ((n + m - 1) // m) * m


def _cdiv(a: int, b: int) -> int:
    return (a + b - 1) // b


def _time_avgpool_kernel(x_ref, o_ref, *, kernel_size: int, t_out: int):
    """x_ref: (bc_tile, T, hw_tile) VMEM; o_ref: (bc_tile, t_out, hw_tile) VMEM.

    out[:, t, :] = mean_k x[:, clamp(2t + k - (ks-1), 0), :]
    (the clamp-to-0 implements the causal first-frame replicate padding).
    Output is stored in sublane-aligned chunks of 8 time rows.
    """
    shift = kernel_size - 1
    inv = 1.0 / kernel_size
    chunk = 8  # f32 sublane height -> unmasked stores for full chunks
    for t0 in range(0, t_out, chunk):
        rows = []
        for t in range(t0, min(t0 + chunk, t_out)):
            acc = x_ref[:, max(2 * t - shift, 0), :].astype(jnp.float32)
            for k in range(1, kernel_size):
                src = max(2 * t + k - shift, 0)          # static int index
                acc = acc + x_ref[:, src, :].astype(jnp.float32)
            rows.append(acc * inv)
        o_ref[:, t0:t0 + len(rows), :] = (
            jnp.stack(rows, axis=1).astype(o_ref.dtype))


def _device_gen() -> str:
    try:
        kind = jax.devices()[0].device_kind.lower()
    except Exception:
        return "unknown"
    for tag in ("v7", "v6", "v5"):
        if tag in kind:
            return tag
    return "unknown"


def _pick_tiles(bc: int, T: int, t_out: int, hw: int,
                itemsize: int, gen: str) -> tuple[int, int]:
    """Pick (bc_tile, hw_tile) so the double-buffered in+out block footprint
    (with sublane padding) stays under the per-generation scoped-VMEM default
    while blocks stay large enough to stream HBM efficiently."""
    # sublane packing: 32-bit -> 8 rows/vreg, 16-bit -> 16, 8-bit -> 32
    sub = {4: 8, 2: 16, 1: 32}.get(itemsize, 8)
    t_pad = _round_up(T, sub)
    to_pad = _round_up(t_out, sub)

    # Total live footprint budget: 2 x (input block + output block).
    # v5e default scoped VMEM = 16 MiB, v6e/v7x = 32 MiB (v7x: 64 MiB phys).
    budget = {"v5": 12 << 20, "v6": 24 << 20, "v7": 24 << 20}.get(gen, 12 << 20)

    row_bytes = 2 * (t_pad + to_pad) * hw * itemsize      # one bc row, in+out, x2 buf
    if row_bytes <= budget or hw < 128:
        hw_tile = hw                                      # full (== array dim) lane extent
        bc_tile = max(1, min(bc, budget // max(row_bytes, 1)))
    else:
        # Must tile the lane axis: hw_tile a multiple of 128.
        col_bytes = 2 * (t_pad + to_pad) * 128 * itemsize
        hw_tile = max(128, (budget // col_bytes) * 128)
        hw_tile = min(hw_tile, _round_up(hw, 128))
        bc_tile = 1

    if gen == "v7":
        # Two TensorCores share the 'parallel' grid: keep >= 2 steps and an
        # even total step count so the split is balanced.
        n_bc = _cdiv(bc, bc_tile)
        n_hw = _cdiv(hw, hw_tile)
        if n_bc * n_hw < 2 and bc >= 2:
            bc_tile = _cdiv(bc, 2)
            n_bc = _cdiv(bc, bc_tile)
        if n_bc * n_hw > 1 and (n_bc * n_hw) % 2 == 1:
            bc_tile = max(1, _cdiv(bc, n_bc + 1))

    return bc_tile, hw_tile


def time_downsample2x(x: jax.Array, kernel_size: int = 3) -> jax.Array:
    """x: (B, C, T, H, W) -> (B, C, (T-1)//2 + 1, H, W)."""
    B, C, T, H, W = x.shape
    t_out = (T - 1) // 2 + 1
    hw = H * W
    bc = B * C
    xf = x.reshape(bc, T, hw)                 # free reshape, no data movement

    itemsize = x.dtype.itemsize
    bc_tile, hw_tile = _pick_tiles(bc, T, t_out, hw, itemsize, _device_gen())
    grid = (_cdiv(bc, bc_tile), _cdiv(hw, hw_tile))

    cost = pl.CostEstimate(
        flops=int(bc) * int(hw) * int(t_out) * int(kernel_size),
        transcendentals=0,
        bytes_accessed=int(bc) * int(hw) * (int(T) + int(t_out)) * int(itemsize),
    )

    out = pl.pallas_call(
        functools.partial(_time_avgpool_kernel,
                          kernel_size=kernel_size, t_out=t_out),
        out_shape=jax.ShapeDtypeStruct((bc, t_out, hw), x.dtype),
        grid=grid,
        in_specs=[pl.BlockSpec((bc_tile, T, hw_tile), lambda i, j: (i, 0, j))],
        out_specs=pl.BlockSpec((bc_tile, t_out, hw_tile), lambda i, j: (i, 0, j)),
        compiler_params=pltpu.CompilerParams(
            dimension_semantics=("parallel", "parallel")),
        cost_estimate=cost,
    )(xf)

    return out.reshape(B, C, t_out, H, W)


def _reference(x: jax.Array, kernel_size: int = 3) -> jax.Array:
    """Pure-JAX reference mirroring the PyTorch forward (f32 accumulation)."""
    xf = x.astype(jnp.float32)
    first = jnp.repeat(xf[:, :, :1], kernel_size - 1, axis=2)
    xp = jnp.concatenate([first, xf], axis=2)
    t_out = (x.shape[2] - 1) // 2 + 1
    windows = [xp[:, :, k:k + 2 * (t_out - 1) + 1:2]
               for k in range(kernel_size)]
    return (sum(windows) / kernel_size).astype(x.dtype)


if __name__ == "__main__":
    key = jax.random.PRNGKey(0)
    B, C, T, H, W = 2, 4, 8, 16, 16
    x = jax.random.normal(key, (B, C, T, H, W), dtype=jnp.float32)

    out = jax.block_until_ready(time_downsample2x(x, kernel_size=3))
    ref = _reference(x, kernel_size=3)
    assert out.shape == (B, C, (T - 1) // 2 + 1, H, W), out.shape
    assert jnp.allclose(out, ref, atol=1e-5, rtol=1e-5), "f32 mismatch"

    # Odd T exercises the causal boundary and the t_out formula; odd bc (=3)
    # exercises the ragged (cdiv) bc tiling path.
    x2 = jax.random.normal(jax.random.PRNGKey(1), (1, 3, 7, 16, 16),
                           dtype=jnp.float32)
    out2 = jax.block_until_ready(time_downsample2x(x2, kernel_size=3))
    assert out2.shape == (1, 3, 4, 16, 16), out2.shape
    assert jnp.allclose(out2, _reference(x2, 3), atol=1e-5, rtol=1e-5)

    # bf16 I/O path (half the HBM traffic when activations are bf16).
    xb = x.astype(jnp.bfloat16)
    outb = jax.block_until_ready(time_downsample2x(xb, kernel_size=3))
    assert outb.dtype == jnp.bfloat16
    assert jnp.allclose(outb.astype(jnp.float32),
                        _reference(xb, 3).astype(jnp.float32),
                        atol=3e-2, rtol=3e-2)

    print("KERNEL_OK")
</pallas_src>

<mosaic_0001>
module attributes {stable_mosaic.version = 11 : i64} {
  func.func @_time_avgpool_kernel(%arg0: i32, %arg1: i32, %arg2: memref<8x8x256xf32, #tpu.memory_space<vmem>>, %arg3: memref<8x4x256xf32, #tpu.memory_space<vmem>>) attributes {dimension_semantics = [#tpu.dimension_semantics<parallel>, #tpu.dimension_semantics<parallel>], iteration_bounds = array<i64: 1, 1>, scalar_prefetch = 0 : i64, scratch_operands = 0 : i64, tpu.core_type = #tpu.core_type<tc>, window_params = [{transform_indices = @transform_0, window_bounds = array<i64: 8, 8, 256>}, {transform_indices = @transform_1, window_bounds = array<i64: 8, 4, 256>}]} {
    %c0 = arith.constant 0 : index
    %c0_0 = arith.constant 0 : index
    %c0_1 = arith.constant 0 : index
    %0 = vector.load %arg2[%c0, %c0_0, %c0_1] : memref<8x8x256xf32, #tpu.memory_space<vmem>>, vector<8x1x256xf32>
    %1 = vector.shape_cast %0 : vector<8x1x256xf32> to vector<8x256xf32>
    %c0_2 = arith.constant 0 : index
    %c0_3 = arith.constant 0 : index
    %c0_4 = arith.constant 0 : index
    %2 = vector.load %arg2[%c0_2, %c0_3, %c0_4] : memref<8x8x256xf32, #tpu.memory_space<vmem>>, vector<8x1x256xf32>
    %3 = vector.shape_cast %2 : vector<8x1x256xf32> to vector<8x256xf32>
    %4 = arith.addf %1, %3 : vector<8x256xf32>
    %c0_5 = arith.constant 0 : index
    %c0_6 = arith.constant 0 : index
    %c0_7 = arith.constant 0 : index
    %5 = vector.load %arg2[%c0_5, %c0_6, %c0_7] : memref<8x8x256xf32, #tpu.memory_space<vmem>>, vector<8x1x256xf32>
    %6 = vector.shape_cast %5 : vector<8x1x256xf32> to vector<8x256xf32>
    %7 = arith.addf %4, %6 : vector<8x256xf32>
    %cst = arith.constant 0.333333343 : f32
    %8 = vector.broadcast %cst : f32 to vector<8x256xf32>
    %9 = arith.mulf %7, %8 : vector<8x256xf32>
    %c0_8 = arith.constant 0 : index
    %c0_9 = arith.constant 0 : index
    %c0_10 = arith.constant 0 : index
    %10 = vector.load %arg2[%c0_8, %c0_9, %c0_10] : memref<8x8x256xf32, #tpu.memory_space<vmem>>, vector<8x1x256xf32>
    %11 = vector.shape_cast %10 : vector<8x1x256xf32> to vector<8x256xf32>
    %c0_11 = arith.constant 0 : index
    %c1 = arith.constant 1 : index
    %c0_12 = arith.constant 0 : index
    %12 = vector.load %arg2[%c0_11, %c1, %c0_12] : memref<8x8x256xf32, #tpu.memory_space<vmem>>, vector<8x1x256xf32>
    %13 = vector.shape_cast %12 : vector<8x1x256xf32> to vector<8x256xf32>
    %14 = arith.addf %11, %13 : vector<8x256xf32>
    %c0_13 = arith.constant 0 : index
    %c2 = arith.constant 2 : index
    %c0_14 = arith.constant 0 : index
    %15 = vector.load %arg2[%c0_13, %c2, %c0_14] : memref<8x8x256xf32, #tpu.memory_space<vmem>>, vector<8x1x256xf32>
    %16 = vector.shape_cast %15 : vector<8x1x256xf32> to vector<8x256xf32>
    %17 = arith.addf %14, %16 : vector<8x256xf32>
    %cst_15 = arith.constant 0.333333343 : f32
    %18 = vector.broadcast %cst_15 : f32 to vector<8x256xf32>
    %19 = arith.mulf %17, %18 : vector<8x256xf32>
    %c0_16 = arith.constant 0 : index
    %c2_17 = arith.constant 2 : index
    %c0_18 = arith.constant 0 : index
    %20 = vector.load %arg2[%c0_16, %c2_17, %c0_18] : memref<8x8x256xf32, #tpu.memory_space<vmem>>, vector<8x1x256xf32>
    %21 = vector.shape_cast %20 : vector<8x1x256xf32> to vector<8x256xf32>
    %c0_19 = arith.constant 0 : index
    %c3 = arith.constant 3 : index
    %c0_20 = arith.constant 0 : index
    %22 = vector.load %arg2[%c0_19, %c3, %c0_20] : memref<8x8x256xf32, #tpu.memory_space<vmem>>, vector<8x1x256xf32>
    %23 = vector.shape_cast %22 : vector<8x1x256xf32> to vector<8x256xf32>
    %24 = arith.addf %21, %23 : vector<8x256xf32>
    %c0_21 = arith.constant 0 : index
    %c4 = arith.constant 4 : index
    %c0_22 = arith.constant 0 : index
    %25 = vector.load %arg2[%c0_21, %c4, %c0_22] : memref<8x8x256xf32, #tpu.memory_space<vmem>>, vector<8x1x256xf32>
    %26 = vector.shape_cast %25 : vector<8x1x256xf32> to vector<8x256xf32>
    %27 = arith.addf %24, %26 : vector<8x256xf32>
    %cst_23 = arith.constant 0.333333343 : f32
    %28 = vector.broadcast %cst_23 : f32 to vector<8x256xf32>
    %29 = arith.mulf %27, %28 : vector<8x256xf32>
    %c0_24 = arith.constant 0 : index
    %c4_25 = arith.constant 4 : index
    %c0_26 = arith.constant 0 : index
    %30 = vector.load %arg2[%c0_24, %c4_25, %c0_26] : memref<8x8x256xf32, #tpu.memory_space<vmem>>, vector<8x1x256xf32>
    %31 = vector.shape_cast %30 : vector<8x1x256xf32> to vector<8x256xf32>
    %c0_27 = arith.constant 0 : index
    %c5 = arith.constant 5 : index
    %c0_28 = arith.constant 0 : index
    %32 = vector.load %arg2[%c0_27, %c5, %c0_28] : memref<8x8x256xf32, #tpu.memory_space<vmem>>, vector<8x1x256xf32>
    %33 = vector.shape_cast %32 : vector<8x1x256xf32> to vector<8x256xf32>
    %34 = arith.addf %31, %33 : vector<8x256xf32>
    %c0_29 = arith.constant 0 : index
    %c6 = arith.constant 6 : index
    %c0_30 = arith.constant 0 : index
    %35 = vector.load %arg2[%c0_29, %c6, %c0_30] : memref<8x8x256xf32, #tpu.memory_space<vmem>>, vector<8x1x256xf32>
    %36 = vector.shape_cast %35 : vector<8x1x256xf32> to vector<8x256xf32>
    %37 = arith.addf %34, %36 : vector<8x256xf32>
    %cst_31 = arith.constant 0.333333343 : f32
    %38 = vector.broadcast %cst_31 : f32 to vector<8x256xf32>
    %39 = arith.mulf %37, %38 : vector<8x256xf32>
    %40 = vector.shape_cast %9 : vector<8x256xf32> to vector<8x1x256xf32>
    %41 = vector.shape_cast %19 : vector<8x256xf32> to vector<8x1x256xf32>
    %42 = vector.shape_cast %29 : vector<8x256xf32> to vector<8x1x256xf32>
    %43 = vector.shape_cast %39 : vector<8x256xf32> to vector<8x1x256xf32>
    %44 = tpu.concatenate %40, %41, %42, %43 in 1 : vector<8x1x256xf32>, vector<8x1x256xf32>, vector<8x1x256xf32>, vector<8x1x256xf32> -> vector<8x4x256xf32>
    %c0_32 = arith.constant 0 : index
    %c0_33 = arith.constant 0 : index
    %c0_34 = arith.constant 0 : index
    %45 = vector.load %arg3[%c0_32, %c0_33, %c0_34] : memref<8x4x256xf32, #tpu.memory_space<vmem>>, vector<8x4x256xf32>
    tpu.vector_store %arg3[%c0_32, %c0_33, %c0_34], %44 {strides = array<i32>} : memref<8x4x256xf32, #tpu.memory_space<vmem>>, vector<8x4x256xf32>,
    return
  }
  func.func @transform_0(%arg0: i32, %arg1: i32) -> (i32, i32, i32) {
    %c0_i32 = arith.constant 0 : i32
    %c0_i32_0 = arith.constant 0 : i32
    return %arg0, %c0_i32, %arg1 : i32, i32, i32
  }
  func.func @transform_1(%arg0: i32, %arg1: i32) -> (i32, i32, i32) {
    %c0_i32 = arith.constant 0 : i32
    %c0_i32_0 = arith.constant 0 : i32
    return %arg0, %c0_i32, %arg1 : i32, i32, i32
  }
}

</mosaic_0001>

<bundles_post_ra>
// kernel: tpu_custom_call.1
= control target key start
LH: loop header
LB: loop body
LE: loop exit
PB: predicated region body
PF: predicated region fallthrough
CT: control target
= control target key end

     0   :  { %6 = vsyncpa [#allocation3], 0  ;;  %s900_s0 = inlined_call_operand.hbm [shape: f32[8,8,256], index: 0, kind: input, shape index: {}]   ;;  %s901_s1 = inlined_call_operand.hbm [shape: f32[8,4,256], index: 1, kind: output, shape index: {}]  }
   0x1   :  { %7 = vsyncpa [#allocation4], 0  ;;  %s744_s6 = smov [#allocation2]   ;;  %s696_s10 = scalar_lea.hbm %s900_s0, 2048 }
   0x2   :  { %s13_s7 = sshll.u32 %s744_s6, 4  ;;  %p697_p0 = scmp.ne.s32.totalorder %s900_s0, %s696_s10  ;;  %s14_s7 = int_to_ptr.vmem [resolvable:$true] %s13_s7 }
   0x3   :  { %p700_p1 = scmp.lt.u32.totalorder %s696_s10, %s900_s0 }
   0x5   :  { %p702_p2 = pnand %p700_p1, %p697_p0 }
   0x7   :  { %705 = shalt.err (!%p702_p2)
}
   0x8   :  { %s706_s15 = scalar_lea.vmem %s14_s7, 2048  ;;  %p711_p4 = scmp.lt.s32.totalorder %s14_s7, %s14_s7 }
   0x9   :  { %p707_p3 = scmp.ne.s32.totalorder %s14_s7, %s706_s15  ;;  %p712_p5 = scmp.lt.s32.totalorder %s706_s15, %s706_s15 }
   0xb   :  { %p713_p6 = por %p712_p5, %p711_p4 }
   0xd   :  { %p714_p7 = pnand %p713_p6, %p707_p3 }
   0xf   :  { %717 = shalt.err (!%p714_p7)
}
  0x10   :  { %s745_s16 = smov 256   ;;  %s746_s17 = smov 16  }
  0x11   :  { %19 = dma.hbm_to_vmem [thread:$0]  %s900_s0, 2048, %s14_s7, [#allocation3], %s745_s16, %s745_s16, %s746_s17  }
  0x12   :  { %740 = dma.done.wait [#allocation3], 2048  }
  0x13   :  { %741 = vsyncadd [#allocation3], 4294965248  ;;  %v238_v0 = vlaneseq  ;;  %vm582_vm0 = vcmask 1040384   ;;  %vm599_vm1 = vcmask 1041408   ;;  %vm616_vm2 = vcmask 1042432   ;;  %s747_s0 = smov [#allocation5]  }
  0x14   :  { %v23_v4 = vld [vmem:[#allocation2] ss:$8 sm:$0x3]  ;;  %v63_v5 = vld [vmem:[#allocation2 + $0x1] ss:$8 sm:$0x3] }
  0x15   :  { %v239_v1 = vshrl.u32 %v238_v0, 7  ;;  %v38_v6 = vadd.f32 %v23_v4, %v23_v4  ;;  %v78_v7 = vadd.f32 %v63_v5, %v23_v4  ;;  %v87_v8 = vld [vmem:[#allocation2 + $0x2] ss:$8 sm:$0x3]  ;;  %s678_s20 = sshll.u32 %s747_s0, 4  ;;  %s679_s20 = int_to_ptr.vmem [resolvable:$true] %s678_s20 }
  0x16   :  { %v119_v9 = vld [vmem:[#allocation2 + $0x3] ss:$8 sm:$0x3]  ;;  %v143_v11 = vld [vmem:[#allocation2 + $0x4] ss:$8 sm:$0x3]  ;;  %p723_p9 = scmp.lt.s32.totalorder %s679_s20, %s679_s20 }
  0x17   :  { %v772_v2 = vsub.s32 0, %v239_v1  ;;  %v774_v3 = vsub.s32 1, %v239_v1  ;;  %v134_v10 = vadd.f32 %v119_v9, %v87_v8  ;;  %v175_v12 = vld [vmem:[#allocation2 + $0x5] ss:$8 sm:$0x3]  ;;  %v46_v13 = vadd.f32 %v38_v6, %v23_v4  ;;  %s718_s21 = scalar_lea.vmem %s679_s20, 1024 }
  0x18   :  { %v102_v14 = vadd.f32 %v87_v8, %v78_v7  ;;  %v190_v15 = vadd.f32 %v175_v12, %v143_v11  ;;  %v199_v16 = vld [vmem:[#allocation2 + $0x6] ss:$8 sm:$0x3]  ;;  %v25_v17 = vld [vmem:[#allocation2 + $0x10] ss:$8 sm:$0x3]  ;;  %p719_p8 = scmp.ne.s32.totalorder %s679_s20, %s718_s21  ;;  %p724_p10 = scmp.lt.s32.totalorder %s718_s21, %s718_s21 }
  0x19   :  { %v158_v18 = vadd.f32 %v143_v11, %v134_v10  ;;  %v39_v19 = vadd.f32 %v25_v17, %v25_v17  ;;  %v65_v20 = vld [vmem:[#allocation2 + $0x11] ss:$8 sm:$0x3]  ;;  %v89_v21 = vld [vmem:[#allocation2 + $0x12] ss:$8 sm:$0x3] }
  0x1a   :  { %v54_v22 = vmul.f32 0.33333334, %v46_v13  ;;  %v110_v23 = vmul.f32 0.33333334, %v102_v14  ;;  %v214_v24 = vadd.f32 %v199_v16, %v190_v15  ;;  %v79_v25 = vadd.f32 %v65_v20, %v25_v17  ;;  %p725_p11 = por %p724_p10, %p723_p9 }
  0x1b   :  { %v166_v26 = vmul.f32 0.33333334, %v158_v18  ;;  %v47_v27 = vadd.f32 %v39_v19, %v25_v17  ;;  %v121_v28 = vld [vmem:[#allocation2 + $0x13] ss:$8 sm:$0x3] }
  0x1c   :  { %v222_v29 = vmul.f32 0.33333334, %v214_v24  ;;  %v241_v30 = vrot.slane %v54_v22, %v772_v2  ;;  %v245_v31 = vrot.slane %v54_v22, %v774_v3  ;;  %v329_v32 = vrot.slane %v110_v23, %v772_v2  ;;  %v145_v33 = vld [vmem:[#allocation2 + $0x14] ss:$8 sm:$0x3]  ;;  %p726_p12 = pnand %p725_p11, %p719_p8 }
  0x1d   :  { %v333_v34 = vrot.slane %v110_v23, %v774_v3  ;;  %v417_v35 = vrot.slane %v166_v26, %v772_v2  ;;  %v421_v36 = vrot.slane %v166_v26, %v774_v3  ;;  %v55_v37 = vmul.f32 0.33333334, %v47_v27  ;;  %v177_v38 = vld [vmem:[#allocation2 + $0x15] ss:$8 sm:$0x3] }
  0x1e   :  { %v505_v39 = vrot.slane %v222_v29, %v772_v2  ;;  %v509_v40 = vrot.slane %v222_v29, %v774_v3  ;;  %v583_v41 = vsel %vm582_vm0, %v241_v30, %v329_v32  ;;  %v103_v42 = vadd.f32 %v89_v21, %v79_v25  ;;  %v201_v43 = vld [vmem:[#allocation2 + $0x16] ss:$8 sm:$0x3]  ;;  %v27_v44 = vld [vmem:[#allocation2 + $0x20] ss:$8 sm:$0x3] }
  0x1f   :  { %v584_v45 = vsel %vm582_vm0, %v245_v31, %v333_v34  ;;  %v600_v46 = vsel %vm599_vm1, %v583_v41, %v417_v35  ;;  %v135_v47 = vadd.f32 %v121_v28, %v89_v21  ;;  %v191_v48 = vadd.f32 %v177_v38, %v145_v33  ;;  %v67_v49 = vld [vmem:[#allocation2 + $0x21] ss:$8 sm:$0x3]  ;;  %v91_v50 = vld [vmem:[#allocation2 + $0x22] ss:$8 sm:$0x3] }
  0x20   :  { %v601_v51 = vsel %vm599_vm1, %v584_v45, %v421_v36  ;;  %v617_v52 = vsel %vm616_vm2, %v600_v46, %v505_v39  ;;  %v111_v53 = vmul.f32 0.33333334, %v103_v42  ;;  %v249_v54 = vrot.slane %v55_v37, %v772_v2  ;;  %v123_v55 = vld [vmem:[#allocation2 + $0x23] ss:$8 sm:$0x3] }
  0x21   :  { %v618_v56 = vsel %vm616_vm2, %v601_v51, %v509_v40  ;;  %v159_v57 = vadd.f32 %v145_v33, %v135_v47  ;;  %v215_v58 = vadd.f32 %v201_v43, %v191_v48  ;;  %v253_v59 = vrot.slane %v55_v37, %v774_v3  ;;  %v147_v60 = vld [vmem:[#allocation2 + $0x24] ss:$8 sm:$0x3]  ;;  %v179_v61 = vld [vmem:[#allocation2 + $0x25] ss:$8 sm:$0x3] }
  0x22   :  { %v649_v62 = vcombine.low %v617_v52, %v618_v56  ;;  %v337_v63 = vrot.slane %v111_v53, %v772_v2  ;;  %v341_v0 = vrot.slane %v111_v53, %v774_v3  ;;  %v40_v1 = vadd.f32 %v27_v44, %v27_v44  ;;  %v203_v4 = vld [vmem:[#allocation2 + $0x26] ss:$8 sm:$0x3]  ;;  %v29_v13 = vld [vmem:[#allocation2 + $0x30] ss:$8 sm:$0x3] }
  0x23   :  { %v167_v5 = vmul.f32 0.33333334, %v159_v57  ;;  %v223_v6 = vmul.f32 0.33333334, %v215_v58  ;;  %v80_v7 = vadd.f32 %v67_v49, %v27_v44  ;;  %v136_v8 = vadd.f32 %v123_v55, %v91_v50 }
  0x24   :  { %665 = vst [vmem:[#allocation5] sm:$0xff] %v649_v62  ;;  %v585_v9 = vsel %vm582_vm0, %v249_v54, %v337_v63  ;;  %v586_v10 = vsel %vm582_vm0, %v253_v59, %v341_v0  ;;  %v48_v11 = vadd.f32 %v40_v1, %v27_v44  ;;  %v192_v12 = vadd.f32 %v179_v61, %v147_v60  ;;  %v69_v14 = vld [vmem:[#allocation2 + $0x31] ss:$8 sm:$0x3] }
  0x25   :  { %v425_v15 = vrot.slane %v167_v5, %v772_v2  ;;  %v429_v16 = vrot.slane %v167_v5, %v774_v3  ;;  %v513_v17 = vrot.slane %v223_v6, %v772_v2  ;;  %v517_v18 = vrot.slane %v223_v6, %v774_v3  ;;  %v93_v23 = vld [vmem:[#allocation2 + $0x32] ss:$8 sm:$0x3]  ;;  %v125_v28 = vld [vmem:[#allocation2 + $0x33] ss:$8 sm:$0x3] }
  0x26   :  { %v56_v19 = vmul.f32 0.33333334, %v48_v11  ;;  %v104_v20 = vadd.f32 %v91_v50, %v80_v7  ;;  %v160_v21 = vadd.f32 %v147_v60, %v136_v8  ;;  %v216_v22 = vadd.f32 %v203_v4, %v192_v12  ;;  %v149_v29 = vld [vmem:[#allocation2 + $0x34] ss:$8 sm:$0x3] }
  0x27   :  { %v602_v24 = vsel %vm599_vm1, %v585_v9, %v425_v15  ;;  %v603_v25 = vsel %vm599_vm1, %v586_v10, %v429_v16  ;;  %v41_v26 = vadd.f32 %v29_v13, %v29_v13  ;;  %v81_v27 = vadd.f32 %v69_v14, %v29_v13  ;;  %v181_v38 = vld [vmem:[#allocation2 + $0x35] ss:$8 sm:$0x3]  ;;  %v205_v47 = vld [vmem:[#allocation2 + $0x36] ss:$8 sm:$0x3] }
  0x28   :  { %v619_v30 = vsel %vm616_vm2, %v602_v24, %v513_v17  ;;  %v620_v31 = vsel %vm616_vm2, %v603_v25, %v517_v18  ;;  %v112_v32 = vmul.f32 0.33333334, %v104_v20  ;;  %v168_v33 = vmul.f32 0.33333334, %v160_v21 }
  0x29   :  { %v650_v34 = vcombine.low %v619_v30, %v620_v31  ;;  %v224_v35 = vmul.f32 0.33333334, %v216_v22  ;;  %v257_v36 = vrot.slane %v56_v19, %v772_v2  ;;  %v261_v37 = vrot.slane %v56_v19, %v774_v3  ;;  %v31_v48 = vld [vmem:[#allocation2 + $0x40] ss:$8 sm:$0x3] }
  0x2a   :  { %v345_v39 = vrot.slane %v112_v32, %v772_v2  ;;  %v349_v40 = vrot.slane %v112_v32, %v774_v3  ;;  %v433_v41 = vrot.slane %v168_v33, %v772_v2  ;;  %v437_v42 = vrot.slane %v168_v33, %v774_v3  ;;  %v71_v53 = vld [vmem:[#allocation2 + $0x41] ss:$8 sm:$0x3]  ;;  %v95_v54 = vld [vmem:[#allocation2 + $0x42] ss:$8 sm:$0x3] }
  0x2b   :  { %666 = vst [vmem:[#allocation5 + $0x8] sm:$0xff] %v650_v34  ;;  %v521_v43 = vrot.slane %v224_v35, %v772_v2  ;;  %v525_v44 = vrot.slane %v224_v35, %v774_v3  ;;  %v49_v45 = vadd.f32 %v41_v26, %v29_v13  ;;  %v105_v46 = vadd.f32 %v93_v23, %v81_v27  ;;  %v127_v55 = vld [vmem:[#allocation2 + $0x43] ss:$8 sm:$0x3] }
  0x2c   :  { %v587_v49 = vsel %vm582_vm0, %v257_v36, %v345_v39  ;;  %v588_v50 = vsel %vm582_vm0, %v261_v37, %v349_v40  ;;  %v137_v51 = vadd.f32 %v125_v28, %v93_v23  ;;  %v193_v52 = vadd.f32 %v181_v38, %v149_v29  ;;  %v151_v0 = vld [vmem:[#allocation2 + $0x44] ss:$8 sm:$0x3]  ;;  %v183_v1 = vld [vmem:[#allocation2 + $0x45] ss:$8 sm:$0x3] }
  0x2d   :  { %v604_v56 = vsel %vm599_vm1, %v587_v49, %v433_v41  ;;  %v605_v57 = vsel %vm599_vm1, %v588_v50, %v437_v42  ;;  %v57_v58 = vmul.f32 0.33333334, %v49_v45  ;;  %v113_v59 = vmul.f32 0.33333334, %v105_v46 }
  0x2e   :  { %v621_v60 = vsel %vm616_vm2, %v604_v56, %v521_v43  ;;  %v622_v61 = vsel %vm616_vm2, %v605_v57, %v525_v44  ;;  %v161_v62 = vadd.f32 %v149_v29, %v137_v51  ;;  %v217_v63 = vadd.f32 %v205_v47, %v193_v52  ;;  %v207_v16 = vld [vmem:[#allocation2 + $0x46] ss:$8 sm:$0x3]  ;;  %v33_v17 = vld [vmem:[#allocation2 + $0x50] ss:$8 sm:$0x3] }
  0x2f   :  { %v651_v4 = vcombine.low %v621_v60, %v622_v61  ;;  %v265_v5 = vrot.slane %v57_v58, %v772_v2  ;;  %v269_v6 = vrot.slane %v57_v58, %v774_v3  ;;  %v353_v7 = vrot.slane %v113_v59, %v772_v2  ;;  %v73_v30 = vld [vmem:[#allocation2 + $0x51] ss:$8 sm:$0x3]  ;;  %v97_v35 = vld [vmem:[#allocation2 + $0x52] ss:$8 sm:$0x3] }
  0x30   :  { %v169_v8 = vmul.f32 0.33333334, %v161_v62  ;;  %v225_v9 = vmul.f32 0.33333334, %v217_v63  ;;  %v357_v10 = vrot.slane %v113_v59, %v774_v3  ;;  %v42_v11 = vadd.f32 %v31_v48, %v31_v48 }
  0x31   :  { %667 = vst [vmem:[#allocation5 + $0x10] sm:$0xff] %v651_v4  ;;  %v589_v12 = vsel %vm582_vm0, %v265_v5, %v353_v7  ;;  %v82_v13 = vadd.f32 %v71_v53, %v31_v48  ;;  %v138_v14 = vadd.f32 %v127_v55, %v95_v54  ;;  %v194_v15 = vadd.f32 %v183_v1, %v151_v0  ;;  %v129_v36 = vld [vmem:[#allocation2 + $0x53] ss:$8 sm:$0x3] }
  0x32   :  { %v441_v18 = vrot.slane %v169_v8, %v772_v2  ;;  %v445_v19 = vrot.slane %v169_v8, %v774_v3  ;;  %v529_v20 = vrot.slane %v225_v9, %v772_v2  ;;  %v533_v21 = vrot.slane %v225_v9, %v774_v3  ;;  %v153_v37 = vld [vmem:[#allocation2 + $0x54] ss:$8 sm:$0x3]  ;;  %v185_v46 = vld [vmem:[#allocation2 + $0x55] ss:$8 sm:$0x3] }
  0x33   :  { %v590_v22 = vsel %vm582_vm0, %v269_v6, %v357_v10  ;;  %v50_v23 = vadd.f32 %v42_v11, %v31_v48  ;;  %v106_v24 = vadd.f32 %v95_v54, %v82_v13  ;;  %v162_v25 = vadd.f32 %v151_v0, %v138_v14  ;;  %v209_v47 = vld [vmem:[#allocation2 + $0x56] ss:$8 sm:$0x3]  ;;  %v35_v52 = vld [vmem:[#allocation2 + $0x60] ss:$8 sm:$0x3] }
  0x34   :  { %v606_v26 = vsel %vm599_vm1, %v589_v12, %v441_v18  ;;  %v607_v27 = vsel %vm599_vm1, %v590_v22, %v445_v19  ;;  %v218_v28 = vadd.f32 %v207_v16, %v194_v15  ;;  %v43_v29 = vadd.f32 %v33_v17, %v33_v17  ;;  %v75_v53 = vld [vmem:[#allocation2 + $0x61] ss:$8 sm:$0x3]  ;;  %v99_v58 = vld [vmem:[#allocation2 + $0x62] ss:$8 sm:$0x3] }
  0x35   :  { %v623_v31 = vsel %vm616_vm2, %v606_v26, %v529_v20  ;;  %v624_v32 = vsel %vm616_vm2, %v607_v27, %v533_v21  ;;  %v58_v33 = vmul.f32 0.33333334, %v50_v23  ;;  %v114_v34 = vmul.f32 0.33333334, %v106_v24 }
  0x36   :  { %v652_v38 = vcombine.low %v623_v31, %v624_v32  ;;  %v170_v39 = vmul.f32 0.33333334, %v162_v25  ;;  %v226_v40 = vmul.f32 0.33333334, %v218_v28  ;;  %v51_v41 = vadd.f32 %v43_v29, %v33_v17 }
  0x37   :  { %v273_v42 = vrot.slane %v58_v33, %v772_v2  ;;  %v277_v43 = vrot.slane %v58_v33, %v774_v3  ;;  %v361_v44 = vrot.slane %v114_v34, %v772_v2  ;;  %v365_v45 = vrot.slane %v114_v34, %v774_v3  ;;  %v131_v63 = vld [vmem:[#allocation2 + $0x63] ss:$8 sm:$0x3]  ;;  %v155_v0 = vld [vmem:[#allocation2 + $0x64] ss:$8 sm:$0x3] }
  0x38   :  { %668 = vst [vmem:[#allocation5 + $0x18] sm:$0xff] %v652_v38  ;;  %v449_v48 = vrot.slane %v170_v39, %v772_v2  ;;  %v453_v49 = vrot.slane %v170_v39, %v774_v3  ;;  %v537_v50 = vrot.slane %v226_v40, %v772_v2  ;;  %v541_v51 = vrot.slane %v226_v40, %v774_v3  ;;  %v187_v7 = vld [vmem:[#allocation2 + $0x65] ss:$8 sm:$0x3] }
  0x39   :  { %v591_v54 = vsel %vm582_vm0, %v273_v42, %v361_v44  ;;  %v592_v55 = vsel %vm582_vm0, %v277_v43, %v365_v45  ;;  %v59_v56 = vmul.f32 0.33333334, %v51_v41  ;;  %v83_v57 = vadd.f32 %v73_v30, %v33_v17  ;;  %v37_v8 = vld [vmem:[#allocation2 + $0x70] ss:$8 sm:$0x3] }
  0x3a   :  { %v608_v59 = vsel %vm599_vm1, %v591_v54, %v449_v48  ;;  %v609_v60 = vsel %vm599_vm1, %v592_v55, %v453_v49  ;;  %v139_v61 = vadd.f32 %v129_v36, %v97_v35  ;;  %v195_v62 = vadd.f32 %v185_v46, %v153_v37  ;;  %v211_v25 = vld [vmem:[#allocation2 + $0x66] ss:$8 sm:$0x3]  ;;  %v77_v30 = vld [vmem:[#allocation2 + $0x71] ss:$8 sm:$0x3] }
  0x3b   :  { %v625_v1 = vsel %vm616_vm2, %v608_v59, %v537_v50  ;;  %v626_v4 = vsel %vm616_vm2, %v609_v60, %v541_v51  ;;  %v107_v5 = vadd.f32 %v97_v35, %v83_v57  ;;  %v281_v6 = vrot.slane %v59_v56, %v772_v2  ;;  %v101_v39 = vld [vmem:[#allocation2 + $0x72] ss:$8 sm:$0x3]  ;;  %v133_v40 = vld [vmem:[#allocation2 + $0x73] ss:$8 sm:$0x3] }
  0x3c   :  { %v653_v9 = vcombine.low %v625_v1, %v626_v4  ;;  %v163_v10 = vadd.f32 %v153_v37, %v139_v61  ;;  %v219_v11 = vadd.f32 %v209_v47, %v195_v62  ;;  %v285_v12 = vrot.slane %v59_v56, %v774_v3  ;;  %v189_v54 = vld [vmem:[#allocation2 + $0x75] ss:$8 sm:$0x3] }
  0x3d   :  { %v115_v13 = vmul.f32 0.33333334, %v107_v5  ;;  %v44_v14 = vadd.f32 %v35_v52, %v35_v52  ;;  %v84_v15 = vadd.f32 %v75_v53, %v35_v52  ;;  %v140_v16 = vadd.f32 %v131_v63, %v99_v58  ;;  %v157_v53 = vld [vmem:[#allocation2 + $0x74] ss:$8 sm:$0x3] }
  0x3e   :  { %669 = vst [vmem:[#allocation5 + $0x20] sm:$0xff] %v653_v9  ;;  %v171_v17 = vmul.f32 0.33333334, %v163_v10  ;;  %v227_v18 = vmul.f32 0.33333334, %v219_v11  ;;  %v196_v19 = vadd.f32 %v187_v7, %v155_v0  ;;  %v45_v20 = vadd.f32 %v37_v8, %v37_v8 }
  0x3f   :  { %v369_v21 = vrot.slane %v115_v13, %v772_v2  ;;  %v373_v22 = vrot.slane %v115_v13, %v774_v3  ;;  %v52_v23 = vadd.f32 %v44_v14, %v35_v52  ;;  %v108_v24 = vadd.f32 %v99_v58, %v84_v15  ;;  %v213_v63 = vld [vmem:[#allocation2 + $0x76] ss:$8 sm:$0x3] }
  0x40   :  { %v457_v26 = vrot.slane %v171_v17, %v772_v2  ;;  %v461_v27 = vrot.slane %v171_v17, %v774_v3  ;;  %v545_v28 = vrot.slane %v227_v18, %v772_v2  ;;  %v549_v29 = vrot.slane %v227_v18, %v774_v3 }
  0x41   :  { %v593_v31 = vsel %vm582_vm0, %v281_v6, %v369_v21  ;;  %v594_v32 = vsel %vm582_vm0, %v285_v12, %v373_v22  ;;  %v60_v33 = vmul.f32 0.33333334, %v52_v23  ;;  %v116_v34 = vmul.f32 0.33333334, %v108_v24 }
  0x42   :  { %v610_v35 = vsel %vm599_vm1, %v593_v31, %v457_v26  ;;  %v611_v36 = vsel %vm599_vm1, %v594_v32, %v461_v27  ;;  %v164_v37 = vadd.f32 %v155_v0, %v140_v16  ;;  %v220_v38 = vadd.f32 %v211_v25, %v196_v19 }
  0x43   :  { %v627_v41 = vsel %vm616_vm2, %v610_v35, %v545_v28  ;;  %v628_v42 = vsel %vm616_vm2, %v611_v36, %v549_v29  ;;  %v289_v43 = vrot.slane %v60_v33, %v772_v2  ;;  %v293_v44 = vrot.slane %v60_v33, %v774_v3 }
  0x44   :  { %v654_v45 = vcombine.low %v627_v41, %v628_v42  ;;  %v172_v46 = vmul.f32 0.33333334, %v164_v37  ;;  %v228_v47 = vmul.f32 0.33333334, %v220_v38  ;;  %v377_v48 = vrot.slane %v116_v34, %v772_v2 }
  0x45   :  { %v381_v49 = vrot.slane %v116_v34, %v774_v3  ;;  %v53_v50 = vadd.f32 %v45_v20, %v37_v8  ;;  %v85_v51 = vadd.f32 %v77_v30, %v37_v8  ;;  %v141_v52 = vadd.f32 %v133_v40, %v101_v39 }
  0x46   :  { %670 = vst [vmem:[#allocation5 + $0x28] sm:$0xff] %v654_v45  ;;  %v465_v55 = vrot.slane %v172_v46, %v772_v2  ;;  %v469_v56 = vrot.slane %v172_v46, %v774_v3  ;;  %v553_v57 = vrot.slane %v228_v47, %v772_v2  ;;  %v557_v58 = vrot.slane %v228_v47, %v774_v3 }
  0x47   :  { %v595_v59 = vsel %vm582_vm0, %v289_v43, %v377_v48  ;;  %v596_v60 = vsel %vm582_vm0, %v293_v44, %v381_v49  ;;  %v61_v61 = vmul.f32 0.33333334, %v53_v50  ;;  %v109_v62 = vadd.f32 %v101_v39, %v85_v51 }
  0x48   :  { %v612_v0 = vsel %vm599_vm1, %v595_v59, %v465_v55  ;;  %v613_v1 = vsel %vm599_vm1, %v596_v60, %v469_v56  ;;  %v165_v4 = vadd.f32 %v157_v53, %v141_v52  ;;  %v197_v5 = vadd.f32 %v189_v54, %v157_v53 }
  0x49   :  { %v629_v6 = vsel %vm616_vm2, %v612_v0, %v553_v57  ;;  %v630_v7 = vsel %vm616_vm2, %v613_v1, %v557_v58  ;;  %v117_v8 = vmul.f32 0.33333334, %v109_v62  ;;  %v297_v9 = vrot.slane %v61_v61, %v772_v2 }
  0x4a   :  { %v655_v10 = vcombine.low %v629_v6, %v630_v7  ;;  %v173_v11 = vmul.f32 0.33333334, %v165_v4  ;;  %v221_v12 = vadd.f32 %v213_v63, %v197_v5  ;;  %v301_v13 = vrot.slane %v61_v61, %v774_v3 }
  0x4b   :  { %v385_v14 = vrot.slane %v117_v8, %v772_v2  ;;  %v389_v15 = vrot.slane %v117_v8, %v774_v3 }
  0x4c   :  { %671 = vst [vmem:[#allocation5 + $0x30] sm:$0xff] %v655_v10  ;;  %v229_v16 = vmul.f32 0.33333334, %v221_v12  ;;  %v473_v17 = vrot.slane %v173_v11, %v772_v2  ;;  %v477_v18 = vrot.slane %v173_v11, %v774_v3 }
  0x4d   :  { %v597_v19 = vsel %vm582_vm0, %v297_v9, %v385_v14  ;;  %v598_v20 = vsel %vm582_vm0, %v301_v13, %v389_v15 }
  0x4e   :  { %v561_v21 = vrot.slane %v229_v16, %v772_v2  ;;  %v565_v22 = vrot.slane %v229_v16, %v774_v3  ;;  %v614_v23 = vsel %vm599_vm1, %v597_v19, %v473_v17  ;;  %v615_v24 = vsel %vm599_vm1, %v598_v20, %v477_v18 }
  0x50   :  { %v631_v25 = vsel %vm616_vm2, %v614_v23, %v561_v21  ;;  %v632_v26 = vsel %vm616_vm2, %v615_v24, %v565_v22 }
  0x51   :  { %v656_v27 = vcombine.low %v631_v25, %v632_v26 }
  0x53   :  { %672 = vst [vmem:[#allocation5 + $0x38] sm:$0xff] %v656_v27 }
  0x54   :  { %729 = shalt.err (!%p726_p12)
}
  0x55   :  { %s730_s24 = scalar_lea.hbm %s901_s1, 1024 }
  0x56   :  { %p731_p13 = scmp.ne.s32.totalorder %s901_s1, %s730_s24  ;;  %p734_p0 = scmp.lt.u32.totalorder %s730_s24, %s901_s1 }
  0x58   :  { %p736_p1 = pnand %p734_p0, %p731_p13 }
  0x5a   :  { %739 = shalt.err (!%p736_p1)
}
  0x5b   :  { %s748_s29 = smov 128   ;;  %s749_s30 = smov 8  }
  0x5c   :  { %684 = dma.vmem_to_hbm [thread:$0]  %s679_s20, 1024, %s901_s1, [#allocation4], %s748_s29, %s748_s29, %s749_s30  }
  0x5d   :  { %742 = dma.done.wait [#allocation4], 1024  }
  0x5e   :  { %743 = vsyncadd [#allocation4], 4294966272 }
  0x5f   :  { %688 = vsyncpa [#allocation3], 1 }
  0x60   :  { %689 = vsyncpa [#allocation4], 1 }

</bundles_post_ra>
